<compile_context>
chip_gen: v7x
topology: tpu7x:2x2x1
jax: 0.10.0
libtpu: 0.0.40
codegen_flags: <defaults>
</compile_context>

<pallas_src>
import functools

import jax
import jax.numpy as jnp
from jax.experimental import pallas as pl
from jax.experimental.pallas import tpu as pltpu

_LANES = 128
_SUBLANES = 8


def _round_up(a: int, b: int) -> int:
    return ((a + b - 1) // b) * b


def _chip_config():
    """Generation-dependent VMEM budgets (bytes)."""
    kind = ""
    try:
        kind = jax.devices()[0].device_kind.lower()
    except Exception:
        pass
    if "v7" in kind:
        # v7x: 64 MiB VMEM per TensorCore -> stay well inside it.
        return {"vmem_limit": 48 << 20, "single_block_need": 36 << 20,
                "tile_bytes": 4 << 20}
    if ("v6" in kind) or ("v5" in kind) or ("v4" in kind):
        # 128 MiB VMEM chips: use most of it for the no-grid single-block path.
        return {"vmem_limit": 108 << 20, "single_block_need": 96 << 20,
                "tile_bytes": 8 << 20}
    # Unknown / older generation: conservative defaults.
    return {"vmem_limit": 32 << 20, "single_block_need": 20 << 20,
            "tile_bytes": 2 << 20}


def _vmem_footprint_bytes(shape, itemsize):
    """Approximate VMEM bytes for one whole-array block ((8,128) tile padding)."""
    if len(shape) == 0:
        return _SUBLANES * _LANES * itemsize
    if len(shape) == 1:
        # 1-D arrays: assume worst-case sublane waste.
        return _round_up(int(shape[0]), _LANES) * _SUBLANES * itemsize
    lead = 1
    for d in shape[:-2]:
        lead *= int(d)
    return (lead * _round_up(int(shape[-2]), _SUBLANES)
            * _round_up(int(shape[-1]), _LANES) * itemsize)


# ----------------------------- kernels -----------------------------

def _centered_whole_kernel(x_ref, o_ref, *, inv_count):
    """Whole array resident in VMEM: global mean + subtract in one pass (2N traffic)."""
    x = x_ref[...]
    mu = (jnp.sum(x.astype(jnp.float32)) * inv_count).astype(x.dtype)
    o_ref[...] = x - mu


def _sum_kernel(x_ref, sum_ref, acc_ref, *, valid_rows_last):
    """Pass 1: streamed global f32 sum.

    Per-tile partial sums land in an (8, cols) VMEM accumulator via vreg-wise adds; the
    single cross-lane/sublane reduction to (1, 1) runs only on the last grid step. The
    last tile may overhang the array; its out-of-bounds rows are masked out (padding,
    if any, is zeros and never biases the mean because inv_count uses the true count).
    """
    i = pl.program_id(0)
    last = pl.num_programs(0) - 1
    br, cols = x_ref.shape

    @pl.when(i == 0)
    def _():
        sum_ref[...] = jnp.zeros_like(sum_ref)
        acc_ref[...] = jnp.zeros_like(acc_ref)

    x = x_ref[...].astype(jnp.float32)

    @pl.when(i < last)
    def _():
        acc_ref[...] += x.reshape(br // _SUBLANES, _SUBLANES, cols).sum(axis=0)

    @pl.when(i == last)
    def _():
        row = jax.lax.broadcasted_iota(jnp.int32, (br, 1), 0)
        xm = jnp.where(row < valid_rows_last, x, 0.0)
        acc_ref[...] += xm.reshape(br // _SUBLANES, _SUBLANES, cols).sum(axis=0)
        sum_ref[...] = sum_ref[...] + jnp.sum(acc_ref[...])


def _center_kernel(sum_ref, x_ref, o_ref, *, inv_count):
    """Pass 2: y = x - sum * (1/count); sum arrives via SMEM, division fused in-kernel."""
    mu = (sum_ref[0, 0] * inv_count).astype(x_ref.dtype)
    o_ref[...] = x_ref[...] - mu


# ----------------------------- drivers -----------------------------

def _centered_whole(xw, *, inv_count, cfg):
    """Single no-grid pallas_call: whole array in VMEM, 1 HBM read + 1 write."""
    return pl.pallas_call(
        functools.partial(_centered_whole_kernel, inv_count=inv_count),
        out_shape=jax.ShapeDtypeStruct(xw.shape, xw.dtype),
        compiler_params=pltpu.CompilerParams(vmem_limit_bytes=cfg["vmem_limit"]),
    )(xw)


def _centered_streamed(x2, *, inv_count, cfg):
    """Two-pass streamed path for slabs too big to keep resident in VMEM."""
    rows, cols = x2.shape
    dtype = x2.dtype
    itemsize = jnp.dtype(dtype).itemsize

    br = max(_SUBLANES,
             (cfg["tile_bytes"] // (cols * itemsize)) // _SUBLANES * _SUBLANES)
    br = min(br, _round_up(rows, _SUBLANES))
    n_tiles = -(-rows // br)
    valid_rows_last = rows - (n_tiles - 1) * br  # static, in [1, br]

    # Pass 1: global f32 sum (reduction axis -> "arbitrary"; constant output block
    # index keeps the (1,1) sum resident across the grid).
    total_sum = pl.pallas_call(
        functools.partial(_sum_kernel, valid_rows_last=valid_rows_last),
        out_shape=jax.ShapeDtypeStruct((1, 1), jnp.float32),
        grid=(n_tiles,),
        in_specs=[pl.BlockSpec((br, cols), lambda i: (i, 0))],
        out_specs=pl.BlockSpec((1, 1), lambda i: (0, 0)),
        scratch_shapes=[pltpu.VMEM((_SUBLANES, cols), jnp.float32)],
        compiler_params=pltpu.CompilerParams(
            dimension_semantics=("arbitrary",),
            vmem_limit_bytes=cfg["vmem_limit"]),
    )(x2)

    # Pass 2: y = x - mu with the raw sum broadcast from SMEM (division fused in-kernel);
    # tile axis "parallel" so multi-TensorCore chips can shard it.
    # TODO(synk): on v7x, pass 1 still runs on a single TensorCore; per-core partial sums
    # (CORE_PARALLEL leading axis + (2,1) partial-sum output) would recover the other
    # half of the HBM bandwidth for very large inputs.
    y2 = pl.pallas_call(
        functools.partial(_center_kernel, inv_count=inv_count),
        out_shape=jax.ShapeDtypeStruct((rows, cols), dtype),
        grid=(n_tiles,),
        in_specs=[pl.BlockSpec(memory_space=pltpu.MemorySpace.SMEM),
                  pl.BlockSpec((br, cols), lambda i: (i, 0))],
        out_specs=pl.BlockSpec((br, cols), lambda i: (i, 0)),
        compiler_params=pltpu.CompilerParams(
            dimension_semantics=("parallel",),
            vmem_limit_bytes=cfg["vmem_limit"]),
    )(total_sum, x2)
    return y2


# ----------------------------- wrapper -----------------------------

def centered_layer(x):
    """y = x - mean(x) (global mean over ALL elements); same shape and dtype as x."""
    orig_shape = x.shape
    dtype = x.dtype
    total = int(x.size)
    if total == 0:
        return x
    itemsize = jnp.dtype(dtype).itemsize
    cfg = _chip_config()
    inv_count = 1.0 / float(total)

    if total % _LANES == 0:
        # ---- aligned: copy-free lane-dense 2-D slab (reshape is a layout bitcast) ----
        cols = _LANES
        for cand in (1024, 512, 256):
            if total % cand == 0:
                cols = cand
                break
        x2 = x.reshape(total // cols, cols)
        # in + out + elementwise temp + possible f32 cast temp, conservatively counted.
        need = 3 * total * itemsize + total * 4
        if need <= cfg["single_block_need"]:
            y2 = _centered_whole(x2, inv_count=inv_count, cfg=cfg)
        else:
            y2 = _centered_streamed(x2, inv_count=inv_count, cfg=cfg)
        return y2.reshape(orig_shape)

    # ---- unaligned element count ----
    xw = x.reshape(1, 1) if x.ndim == 0 else x
    foot = _vmem_footprint_bytes(xw.shape, itemsize)
    need = 3 * foot + _vmem_footprint_bytes(xw.shape, 4)
    if need <= cfg["single_block_need"]:
        # Whole original-shape array as one block: block dims == array dims, so no
        # (8,128) constraint and no pad / slice copies at all.
        yw = _centered_whole(xw, inv_count=inv_count, cfg=cfg)
        return yw.reshape(orig_shape)

    # Large unaligned fallback: pad the flat view into a lane-dense slab and slice the
    # result back. These two copies add HBM traffic; acceptable because large tensors
    # in practice have 128-aligned element counts and take the copy-free paths above.
    cols = 1024
    rows = -(-total // cols)
    pad = rows * cols - total
    x2 = jnp.pad(x.reshape(-1), (0, pad)).reshape(rows, cols)
    need = 3 * rows * cols * itemsize + rows * cols * 4
    if need <= cfg["single_block_need"]:
        y2 = _centered_whole(x2, inv_count=inv_count, cfg=cfg)
    else:
        y2 = _centered_streamed(x2, inv_count=inv_count, cfg=cfg)
    return y2.reshape(-1)[:total].reshape(orig_shape)


if __name__ == "__main__":
    key = jax.random.PRNGKey(0)

    # Mirrors torch.rand(size=(2, 4)): uniform [0, 1), float32 -> whole-block path.
    X = jax.random.uniform(key, (2, 4), dtype=jnp.float32)
    Y = jax.block_until_ready(centered_layer(X))
    ref = X - jnp.mean(X)
    assert Y.shape == X.shape and Y.dtype == X.dtype
    assert jnp.allclose(Y, ref, atol=1e-6), (Y, ref)
    assert abs(float(jnp.mean(Y))) < 1e-6

    # Unaligned small shape -> whole original-shape block (no pad / slice copies).
    X2 = jax.random.uniform(jax.random.PRNGKey(1), (3, 5, 7), dtype=jnp.float32)
    Y2 = jax.block_until_ready(centered_layer(X2))
    assert jnp.allclose(Y2, X2 - jnp.mean(X2), atol=1e-6)

    # 128-aligned large shape -> copy-free streamed two-pass path (grid > 1).
    X3 = jax.random.uniform(jax.random.PRNGKey(2), (4096, 4096), dtype=jnp.float32)
    Y3 = jax.block_until_ready(centered_layer(X3))
    assert jnp.allclose(Y3, X3 - jnp.mean(X3), atol=1e-4)
    assert abs(float(jnp.mean(Y3))) < 1e-4

    # Unaligned large shape -> padded streamed fallback (masked last tile).
    X4 = jax.random.uniform(jax.random.PRNGKey(3), (2049, 4097), dtype=jnp.float32)
    Y4 = jax.block_until_ready(centered_layer(X4))
    assert jnp.allclose(Y4, X4 - jnp.mean(X4), atol=1e-4)

    print("KERNEL_OK")
</pallas_src>

<mosaic_0001>
module attributes {stable_mosaic.version = 11 : i64} {
  func.func @_centered_whole_kernel(%arg0: memref<2x4xf32, #tpu.memory_space<vmem>>, %arg1: memref<2x4xf32, #tpu.memory_space<vmem>>) attributes {dimension_semantics = [], scalar_prefetch = 0 : i64, scratch_operands = 0 : i64, tpu.core_type = #tpu.core_type<tc>} {
    %c0 = arith.constant 0 : index
    %c0_0 = arith.constant 0 : index
    %0 = vector.load %arg0[%c0, %c0_0] : memref<2x4xf32, #tpu.memory_space<vmem>>, vector<2x4xf32>
    %1 = vector.shape_cast %0 : vector<2x4xf32> to vector<1x2x4xf32>
    %cst = arith.constant dense<0.000000e+00> : vector<1xf32>
    %2 = vector.multi_reduction <add>, %1, %cst [1, 2] : vector<1x2x4xf32> to vector<1xf32>
    %3 = vector.shape_cast %2 : vector<1xf32> to vector<1x1x1xf32>
    %4 = vector.extract %3[0, 0, 0] : f32 from vector<1x1x1xf32>
    %cst_1 = arith.constant 1.250000e-01 : f32
    %5 = arith.mulf %4, %cst_1 : f32
    %6 = vector.broadcast %5 : f32 to vector<2x4xf32>
    %7 = arith.subf %0, %6 : vector<2x4xf32>
    %c0_2 = arith.constant 0 : index
    %c0_3 = arith.constant 0 : index
    %8 = vector.load %arg1[%c0_2, %c0_3] : memref<2x4xf32, #tpu.memory_space<vmem>>, vector<2x4xf32>
    tpu.vector_store %arg1[%c0_2, %c0_3], %7 {strides = array<i32>} : memref<2x4xf32, #tpu.memory_space<vmem>>, vector<2x4xf32>,
    return
  }
}

</mosaic_0001>

<bundles_post_ra>
// kernel: tpu_custom_call.1
= control target key start
LH: loop header
LB: loop body
LE: loop exit
PB: predicated region body
PF: predicated region fallthrough
CT: control target
= control target key end

     0   :  { %6 = vsyncpa [#allocation3], 0  ;;  %s142_s0 = inlined_call_operand.hbm [shape: f32[2,4], index: 0, kind: input, shape index: {}]   ;;  %s143_s1 = inlined_call_operand.hbm [shape: f32[2,4], index: 1, kind: output, shape index: {}]  }
   0x1   :  { %7 = vsyncpa [#allocation4], 0  ;;  %s104_s6 = smov [#allocation2]   ;;  %s56_s10 = scalar_lea.hbm %s142_s0, 32 }
   0x2   :  { %s14_s7 = sshll.u32 %s104_s6, 4  ;;  %p57_p0 = scmp.ne.s32.totalorder %s142_s0, %s56_s10  ;;  %s15_s7 = int_to_ptr.vmem [resolvable:$true] %s14_s7 }
   0x3   :  { %p60_p1 = scmp.lt.u32.totalorder %s56_s10, %s142_s0 }
   0x5   :  { %p62_p2 = pnand %p60_p1, %p57_p0 }
   0x7   :  { %65 = shalt.err (!%p62_p2)
}
   0x8   :  { %s66_s15 = scalar_lea.vmem %s15_s7, 32  ;;  %p71_p4 = scmp.lt.s32.totalorder %s15_s7, %s15_s7 }
   0x9   :  { %p67_p3 = scmp.ne.s32.totalorder %s15_s7, %s66_s15  ;;  %p72_p5 = scmp.lt.s32.totalorder %s66_s15, %s66_s15 }
   0xb   :  { %p73_p6 = por %p72_p5, %p71_p4 }
   0xd   :  { %p74_p7 = pnand %p73_p6, %p67_p3 }
   0xf   :  { %77 = shalt.err (!%p74_p7)
}
  0x10   :  { %17 = dma.hbm_to_vmem [thread:$0]  %s142_s0, 32, %s15_s7, [#allocation3]  }
  0x11   :  { %100 = dma.done.wait [#allocation3], 32  }
  0x12   :  { %101 = vsyncadd [#allocation3], 4294967264  ;;  %vm22_vm0 = vcmask 25600   ;;  %v21_v0 = vld [vmem:[#allocation2] sm:$0x3]  ;;  %s105_s20 = smov [#allocation5]  }
  0x13   :  { %v23_v1 = vsel %vm22_vm0, %v21_v0, 0.0  ;;  %s43_s21 = sshll.u32 %s105_s20, 4  ;;  %s44_s21 = int_to_ptr.vmem [resolvable:$true] %s43_s21 }
  0x14   :  { %24 = vadd.xlane.f32.xlu0 %v23_v1  ;;  %s78_s0 = scalar_lea.vmem %s44_s21, 32  ;;  %p83_p9 = scmp.lt.s32.totalorder %s44_s21, %s44_s21 }
  0x15   :  { %p79_p8 = scmp.ne.s32.totalorder %s44_s21, %s78_s0  ;;  %p84_p10 = scmp.lt.s32.totalorder %s78_s0, %s78_s0 }
  0x17   :  { %p85_p11 = por %p84_p10, %p83_p9 }
  0x19   :  { %p86_p12 = pnand %p85_p11, %p79_p8 }
  0xa1   :  { %v25_v2 = vpop.xlane.xlu0 %24 }
  0xa2   :  { %v26_v3 = vrot.slane %v25_v2, 4 }
  0xa4   :  { %v27_v4 = vadd.f32 %v26_v3, %v25_v2 }
  0xa6   :  { %v28_v5 = vrot.slane %v27_v4, 2 }
  0xa8   :  { %v29_v6 = vadd.f32 %v28_v5, %v27_v4 }
  0xaa   :  { %v30_v7 = vrot.slane %v29_v6, 1 }
  0xac   :  { %v31_v8 = vadd.f32 %v30_v7, %v29_v6 }
  0xae   :  { %52 = vpush %v31_v8 }
  0xdf   :  { %s53_s18 = spop %52 }
  0xe0   :  { %s33_s19 = smul.f32 0.125, %s53_s18 }
  0xe2   :  { %v34_v9 = vstv %s33_s19 }
  0xe3   :  { %v35_v10 = vsub.f32 %v21_v0, %v34_v9 }
  0xe5   :  { %36 = vst.msk [vmem:[#allocation5] sm:$0x3] %vm22_vm0, %v35_v10 }
  0xe6   :  { %89 = shalt.err (!%p86_p12)
}
  0xe7   :  { %s90_s24 = scalar_lea.hbm %s143_s1, 32 }
  0xe8   :  { %p91_p13 = scmp.ne.s32.totalorder %s143_s1, %s90_s24  ;;  %p94_p0 = scmp.lt.u32.totalorder %s90_s24, %s143_s1 }
  0xea   :  { %p96_p1 = pnand %p94_p0, %p91_p13 }
  0xec   :  { %99 = shalt.err (!%p96_p1)
}
  0xed   :  { %46 = dma.vmem_to_hbm [thread:$0]  %s44_s21, 32, %s143_s1, [#allocation4]  }
  0xee   :  { %102 = dma.done.wait [#allocation4], 32  }
  0xef   :  { %103 = vsyncadd [#allocation4], 4294967264 }
  0xf0   :  { %50 = vsyncpa [#allocation3], 1 }
  0xf1   :  { %51 = vsyncpa [#allocation4], 1 }

</bundles_post_ra>
